<compile_context>
chip_gen: v5e
topology: v5e:2x2
jax: 0.10.0
libtpu: 0.0.40
codegen_flags: <defaults>
</compile_context>

<pallas_src>
import functools
import math

import jax
import jax.numpy as jnp
import numpy as np
from jax.experimental import pallas as pl
from jax.experimental.pallas import tpu as pltpu

_F32_EPS = float(np.finfo(np.float32).eps)   # matches torch clamp_probs for float32


def _round_up(x, m):
    return -(-x // m) * m


def _fast_recip(x):
    # EUP approximate reciprocal (separate VLIW slot) + one Newton refinement
    # on the VPU so the result is accurate to ~f32 precision.
    r = pl.reciprocal(x, approx=True)
    return r * (2.0 - x * r)


def _gumbel_softmax_kernel(post_ref, lp_prior_ref, u_ref, kl_ref, samp_ref,
                           *, inv_temperature, n_valid, tile_n):
    j = pl.program_id(0)

    # Refs are (3, B, tile_n): category axis leading (static index), latent
    # axis on lanes.  Each x* slab is a full (sublane, lane) = (B, tile_n) tile.
    x0 = post_ref[0]
    x1 = post_ref[1]
    x2 = post_ref[2]

    # ---- posterior softmax stats: explicit 3-way elementwise ops (VPU only) ----
    m = jnp.maximum(jnp.maximum(x0, x1), x2)
    e0 = jnp.exp(x0 - m)
    e1 = jnp.exp(x1 - m)
    e2 = jnp.exp(x2 - m)
    z = e0 + e1 + e2
    inv_z = _fast_recip(z)
    log_z = jnp.log(z)

    # ---- KL(Categorical(post) || Categorical(prior)), partial sum for this tile ----
    # lp_prior rows are (1, tile_n), precomputed in the wrapper; broadcast over B.
    # KL = sum_c p_c * ((x_c - m) - log Z - q_c)
    #    = sum_c p_c * (x_c - m - q_c) - log Z          (sum_c p_c == 1)
    q0 = lp_prior_ref[0]
    q1 = lp_prior_ref[1]
    q2 = lp_prior_ref[2]
    kl_elem = ((e0 * inv_z) * (x0 - m - q0)
               + (e1 * inv_z) * (x1 - m - q1)
               + (e2 * inv_z) * (x2 - m - q2)
               - log_z)                                 # (B, tile_n)

    if n_valid % tile_n != 0:
        # Mask padded latent columns out of the partial KL sum (last tile only).
        col = j * tile_n + jax.lax.broadcasted_iota(jnp.int32, kl_elem.shape, 1)
        kl_elem = jnp.where(col < n_valid, kl_elem, 0.0)

    kl_ref[...] = jnp.zeros_like(kl_ref) + jnp.sum(kl_elem)

    # ---- rsample: softmax((logits + Gumbel(u)) * inv_temperature) ----
    lo, hi = _F32_EPS, 1.0 - _F32_EPS                   # torch clamp_probs
    g0 = -jnp.log(-jnp.log(jnp.clip(u_ref[0], lo, hi)))
    g1 = -jnp.log(-jnp.log(jnp.clip(u_ref[1], lo, hi)))
    g2 = -jnp.log(-jnp.log(jnp.clip(u_ref[2], lo, hi)))
    s0 = (x0 + g0) * inv_temperature
    s1 = (x1 + g1) * inv_temperature
    s2 = (x2 + g2) * inv_temperature
    ms = jnp.maximum(jnp.maximum(s0, s1), s2)
    f0 = jnp.exp(s0 - ms)
    f1 = jnp.exp(s1 - ms)
    f2 = jnp.exp(s2 - ms)
    inv_f = _fast_recip(f0 + f1 + f2)
    samp_ref[0] = f0 * inv_f
    samp_ref[1] = f1 * inv_f
    samp_ref[2] = f2 * inv_f


def sparse_multivariate_gumbel_softmax_forward(post_logits, prior_logits, uniforms,
                                               temperature, *, tile_n=512):
    """post_logits: (B, N, 3); prior_logits: (N, 3); uniforms: (B, N, 3)."""
    B, N, C = post_logits.shape
    assert C == 3 and prior_logits.shape == (N, C) and uniforms.shape == (B, N, C)

    # --- wrapper-side layout plumbing: (B, N, 3) -> lane-dense (3, B, N) ---
    post_t = jnp.transpose(post_logits.astype(jnp.float32), (2, 0, 1))
    unif_t = jnp.transpose(uniforms.astype(jnp.float32), (2, 0, 1))
    # Prior log-softmax is batch independent: compute once here, not per tile.
    lp_prior = jax.nn.log_softmax(prior_logits.astype(jnp.float32), axis=-1)  # (N, 3)
    lp_prior_t = jnp.transpose(lp_prior, (1, 0))[:, None, :]                  # (3, 1, N)

    tn = min(int(tile_n), _round_up(N, 128))
    n_pad = _round_up(N, tn)
    if n_pad != N:
        pad = ((0, 0), (0, 0), (0, n_pad - N))
        post_t = jnp.pad(post_t, pad)                                  # logits 0
        unif_t = jnp.pad(unif_t, pad, constant_values=0.5)             # safe uniforms
        lp_prior_t = jnp.pad(lp_prior_t, pad,
                             constant_values=math.log(1.0 / 3.0))
    num_tiles = n_pad // tn

    kernel = functools.partial(_gumbel_softmax_kernel,
                               inv_temperature=1.0 / float(temperature),
                               n_valid=int(N), tile_n=int(tn))

    grid_spec = pl.GridSpec(
        grid=(num_tiles,),
        in_specs=[
            pl.BlockSpec((3, B, tn), lambda j: (0, 0, j)),   # posterior logits
            pl.BlockSpec((3, 1, tn), lambda j: (0, 0, j)),   # precomputed prior log-probs
            pl.BlockSpec((3, B, tn), lambda j: (0, 0, j)),   # uniforms
        ],
        out_specs=(
            pl.BlockSpec((1, 8, 128), lambda j: (j, 0, 0)),  # per-tile KL partial
            pl.BlockSpec((3, B, tn), lambda j: (0, 0, j)),   # sample
        ),
    )

    kl_partials, sample_t = pl.pallas_call(
        kernel,
        grid_spec=grid_spec,
        out_shape=(
            jax.ShapeDtypeStruct((num_tiles, 8, 128), jnp.float32),
            jax.ShapeDtypeStruct((3, B, n_pad), jnp.float32),
        ),
        compiler_params=pltpu.CompilerParams(
            dimension_semantics=("parallel",)),
    )(post_t, lp_prior_t, unif_t)

    kl_mean = jnp.sum(kl_partials[:, 0, 0]) / float(B * N)
    sample = jnp.transpose(sample_t[:, :, :N], (1, 2, 0))    # back to (B, N, 3)
    return kl_mean, sample


def _reference_forward(post_logits, prior_logits, uniforms, temperature):
    lp_post = jax.nn.log_softmax(post_logits, axis=-1)
    lp_prior = jax.nn.log_softmax(prior_logits, axis=-1)[None]
    kl = jnp.sum(jnp.exp(lp_post) * (lp_post - lp_prior), axis=-1)
    eps = jnp.finfo(jnp.float32).eps
    u = jnp.clip(uniforms, eps, 1.0 - eps)
    g = -jnp.log(-jnp.log(u))
    sample = jax.nn.softmax((post_logits + g) / temperature, axis=-1)
    return jnp.mean(kl), sample


if __name__ == "__main__":
    # batch=4, latent shape=1024, 3 categories (nn.Parameter(zeros(shape, 3)))
    B, N, C = 4, 1024, 3
    temperature = 0.5

    key = jax.random.PRNGKey(0)
    k_logits, k_unif = jax.random.split(key)

    post_logits = jax.random.normal(k_logits, (B, N, C), dtype=jnp.float32)
    prior_logits = jnp.zeros((N, C), dtype=jnp.float32)   # deterministic init, as in __init__
    uniforms = jax.random.uniform(k_unif, (B, N, C), dtype=jnp.float32)

    kl, sample = sparse_multivariate_gumbel_softmax_forward(
        post_logits, prior_logits, uniforms, temperature, tile_n=256)
    kl = jax.block_until_ready(kl)
    sample = jax.block_until_ready(sample)

    kl_ref, sample_ref = _reference_forward(post_logits, prior_logits, uniforms, temperature)
    assert np.allclose(np.asarray(kl), np.asarray(kl_ref),
                       rtol=1e-4, atol=5e-4), (kl, kl_ref)
    assert np.allclose(np.asarray(sample), np.asarray(sample_ref),
                       rtol=1e-4, atol=5e-4)
    assert sample.shape == (B, N, C)

    print("KERNEL_OK")
</pallas_src>

<mosaic_0001>
module attributes {stable_mosaic.version = 11 : i64} {
  func.func @_gumbel_softmax_kernel(%arg0: i32, %arg1: memref<3x4x256xf32, #tpu.memory_space<vmem>>, %arg2: memref<3x1x256xf32, #tpu.memory_space<vmem>>, %arg3: memref<3x4x256xf32, #tpu.memory_space<vmem>>, %arg4: memref<1x8x128xf32, #tpu.memory_space<vmem>>, %arg5: memref<3x4x256xf32, #tpu.memory_space<vmem>>) attributes {dimension_semantics = [#tpu.dimension_semantics<parallel>], iteration_bounds = array<i64: 4>, scalar_prefetch = 0 : i64, scratch_operands = 0 : i64, tpu.core_type = #tpu.core_type<tc>, window_params = [{transform_indices = @transform_0, window_bounds = array<i64: 3, 4, 256>}, {transform_indices = @transform_1, window_bounds = array<i64: 3, 1, 256>}, {transform_indices = @transform_2, window_bounds = array<i64: 3, 4, 256>}, {transform_indices = @transform_3, window_bounds = array<i64: 1, 8, 128>}, {transform_indices = @transform_4, window_bounds = array<i64: 3, 4, 256>}]} {
    %c0 = arith.constant 0 : index
    %c0_0 = arith.constant 0 : index
    %c0_1 = arith.constant 0 : index
    %0 = vector.load %arg1[%c0, %c0_0, %c0_1] : memref<3x4x256xf32, #tpu.memory_space<vmem>>, vector<1x4x256xf32>
    %1 = vector.shape_cast %0 : vector<1x4x256xf32> to vector<4x256xf32>
    %c1 = arith.constant 1 : index
    %c0_2 = arith.constant 0 : index
    %c0_3 = arith.constant 0 : index
    %2 = vector.load %arg1[%c1, %c0_2, %c0_3] : memref<3x4x256xf32, #tpu.memory_space<vmem>>, vector<1x4x256xf32>
    %3 = vector.shape_cast %2 : vector<1x4x256xf32> to vector<4x256xf32>
    %c2 = arith.constant 2 : index
    %c0_4 = arith.constant 0 : index
    %c0_5 = arith.constant 0 : index
    %4 = vector.load %arg1[%c2, %c0_4, %c0_5] : memref<3x4x256xf32, #tpu.memory_space<vmem>>, vector<1x4x256xf32>
    %5 = vector.shape_cast %4 : vector<1x4x256xf32> to vector<4x256xf32>
    %6 = arith.maximumf %1, %3 : vector<4x256xf32>
    %7 = arith.maximumf %6, %5 : vector<4x256xf32>
    %8 = arith.subf %1, %7 : vector<4x256xf32>
    %9 = math.exp %8 : vector<4x256xf32>
    %10 = arith.subf %3, %7 : vector<4x256xf32>
    %11 = math.exp %10 : vector<4x256xf32>
    %12 = arith.subf %5, %7 : vector<4x256xf32>
    %13 = math.exp %12 : vector<4x256xf32>
    %14 = arith.addf %9, %11 : vector<4x256xf32>
    %15 = arith.addf %14, %13 : vector<4x256xf32>
    %16 = tpu.reciprocal %15 {approx = true} : vector<4x256xf32> -> vector<4x256xf32>
    %17 = arith.mulf %15, %16 : vector<4x256xf32>
    %cst = arith.constant 2.000000e+00 : f32
    %18 = vector.broadcast %cst : f32 to vector<4x256xf32>
    %19 = arith.subf %18, %17 : vector<4x256xf32>
    %20 = arith.mulf %16, %19 : vector<4x256xf32>
    %21 = math.log %15 : vector<4x256xf32>
    %c0_6 = arith.constant 0 : index
    %c0_7 = arith.constant 0 : index
    %c0_8 = arith.constant 0 : index
    %22 = vector.load %arg2[%c0_6, %c0_7, %c0_8] : memref<3x1x256xf32, #tpu.memory_space<vmem>>, vector<1x1x256xf32>
    %23 = vector.shape_cast %22 : vector<1x1x256xf32> to vector<1x256xf32>
    %c1_9 = arith.constant 1 : index
    %c0_10 = arith.constant 0 : index
    %c0_11 = arith.constant 0 : index
    %24 = vector.load %arg2[%c1_9, %c0_10, %c0_11] : memref<3x1x256xf32, #tpu.memory_space<vmem>>, vector<1x1x256xf32>
    %25 = vector.shape_cast %24 : vector<1x1x256xf32> to vector<1x256xf32>
    %c2_12 = arith.constant 2 : index
    %c0_13 = arith.constant 0 : index
    %c0_14 = arith.constant 0 : index
    %26 = vector.load %arg2[%c2_12, %c0_13, %c0_14] : memref<3x1x256xf32, #tpu.memory_space<vmem>>, vector<1x1x256xf32>
    %27 = vector.shape_cast %26 : vector<1x1x256xf32> to vector<1x256xf32>
    %28 = arith.mulf %9, %20 : vector<4x256xf32>
    %29 = arith.subf %1, %7 : vector<4x256xf32>
    %30 = vector.broadcast %23 : vector<1x256xf32> to vector<4x256xf32>
    %31 = arith.subf %29, %30 : vector<4x256xf32>
    %32 = arith.mulf %28, %31 : vector<4x256xf32>
    %33 = arith.mulf %11, %20 : vector<4x256xf32>
    %34 = arith.subf %3, %7 : vector<4x256xf32>
    %35 = vector.broadcast %25 : vector<1x256xf32> to vector<4x256xf32>
    %36 = arith.subf %34, %35 : vector<4x256xf32>
    %37 = arith.mulf %33, %36 : vector<4x256xf32>
    %38 = arith.addf %32, %37 : vector<4x256xf32>
    %39 = arith.mulf %13, %20 : vector<4x256xf32>
    %40 = arith.subf %5, %7 : vector<4x256xf32>
    %41 = vector.broadcast %27 : vector<1x256xf32> to vector<4x256xf32>
    %42 = arith.subf %40, %41 : vector<4x256xf32>
    %43 = arith.mulf %39, %42 : vector<4x256xf32>
    %44 = arith.addf %38, %43 : vector<4x256xf32>
    %45 = arith.subf %44, %21 : vector<4x256xf32>
    %cst_15 = arith.constant 0.000000e+00 : f32
    %46 = vector.broadcast %cst_15 : f32 to vector<1x8x128xf32>
    %47 = vector.shape_cast %45 : vector<4x256xf32> to vector<1x4x256xf32>
    %cst_16 = arith.constant dense<0.000000e+00> : vector<1xf32>
    %48 = vector.multi_reduction <add>, %47, %cst_16 [1, 2] : vector<1x4x256xf32> to vector<1xf32>
    %49 = vector.shape_cast %48 : vector<1xf32> to vector<1x1x1xf32>
    %50 = vector.extract %49[0, 0, 0] : f32 from vector<1x1x1xf32>
    %51 = vector.broadcast %50 : f32 to vector<1x8x128xf32>
    %52 = arith.addf %46, %51 : vector<1x8x128xf32>
    %c0_17 = arith.constant 0 : index
    %c0_18 = arith.constant 0 : index
    %c0_19 = arith.constant 0 : index
    %53 = vector.load %arg4[%c0_17, %c0_18, %c0_19] : memref<1x8x128xf32, #tpu.memory_space<vmem>>, vector<1x8x128xf32>
    tpu.vector_store %arg4[%c0_17, %c0_18, %c0_19], %52 {strides = array<i32>} : memref<1x8x128xf32, #tpu.memory_space<vmem>>, vector<1x8x128xf32>,
    %c0_20 = arith.constant 0 : index
    %c0_21 = arith.constant 0 : index
    %c0_22 = arith.constant 0 : index
    %54 = vector.load %arg3[%c0_20, %c0_21, %c0_22] : memref<3x4x256xf32, #tpu.memory_space<vmem>>, vector<1x4x256xf32>
    %55 = vector.shape_cast %54 : vector<1x4x256xf32> to vector<4x256xf32>
    %cst_23 = arith.constant 1.1920929E-7 : f32
    %cst_24 = arith.constant 0.99999988 : f32
    %56 = vector.broadcast %cst_23 : f32 to vector<4x256xf32>
    %57 = arith.maximumf %56, %55 : vector<4x256xf32>
    %58 = vector.broadcast %cst_24 : f32 to vector<4x256xf32>
    %59 = arith.minimumf %58, %57 : vector<4x256xf32>
    %60 = math.log %59 : vector<4x256xf32>
    %cst_25 = arith.constant 0.000000e+00 : f32
    %61 = vector.broadcast %cst_25 : f32 to vector<4x256xf32>
    %62 = arith.subf %61, %60 : vector<4x256xf32>
    %63 = math.log %62 : vector<4x256xf32>
    %cst_26 = arith.constant 0.000000e+00 : f32
    %64 = vector.broadcast %cst_26 : f32 to vector<4x256xf32>
    %65 = arith.subf %64, %63 : vector<4x256xf32>
    %c1_27 = arith.constant 1 : index
    %c0_28 = arith.constant 0 : index
    %c0_29 = arith.constant 0 : index
    %66 = vector.load %arg3[%c1_27, %c0_28, %c0_29] : memref<3x4x256xf32, #tpu.memory_space<vmem>>, vector<1x4x256xf32>
    %67 = vector.shape_cast %66 : vector<1x4x256xf32> to vector<4x256xf32>
    %cst_30 = arith.constant 1.1920929E-7 : f32
    %cst_31 = arith.constant 0.99999988 : f32
    %68 = vector.broadcast %cst_30 : f32 to vector<4x256xf32>
    %69 = arith.maximumf %68, %67 : vector<4x256xf32>
    %70 = vector.broadcast %cst_31 : f32 to vector<4x256xf32>
    %71 = arith.minimumf %70, %69 : vector<4x256xf32>
    %72 = math.log %71 : vector<4x256xf32>
    %cst_32 = arith.constant 0.000000e+00 : f32
    %73 = vector.broadcast %cst_32 : f32 to vector<4x256xf32>
    %74 = arith.subf %73, %72 : vector<4x256xf32>
    %75 = math.log %74 : vector<4x256xf32>
    %cst_33 = arith.constant 0.000000e+00 : f32
    %76 = vector.broadcast %cst_33 : f32 to vector<4x256xf32>
    %77 = arith.subf %76, %75 : vector<4x256xf32>
    %c2_34 = arith.constant 2 : index
    %c0_35 = arith.constant 0 : index
    %c0_36 = arith.constant 0 : index
    %78 = vector.load %arg3[%c2_34, %c0_35, %c0_36] : memref<3x4x256xf32, #tpu.memory_space<vmem>>, vector<1x4x256xf32>
    %79 = vector.shape_cast %78 : vector<1x4x256xf32> to vector<4x256xf32>
    %cst_37 = arith.constant 1.1920929E-7 : f32
    %cst_38 = arith.constant 0.99999988 : f32
    %80 = vector.broadcast %cst_37 : f32 to vector<4x256xf32>
    %81 = arith.maximumf %80, %79 : vector<4x256xf32>
    %82 = vector.broadcast %cst_38 : f32 to vector<4x256xf32>
    %83 = arith.minimumf %82, %81 : vector<4x256xf32>
    %84 = math.log %83 : vector<4x256xf32>
    %cst_39 = arith.constant 0.000000e+00 : f32
    %85 = vector.broadcast %cst_39 : f32 to vector<4x256xf32>
    %86 = arith.subf %85, %84 : vector<4x256xf32>
    %87 = math.log %86 : vector<4x256xf32>
    %cst_40 = arith.constant 0.000000e+00 : f32
    %88 = vector.broadcast %cst_40 : f32 to vector<4x256xf32>
    %89 = arith.subf %88, %87 : vector<4x256xf32>
    %90 = arith.addf %1, %65 : vector<4x256xf32>
    %cst_41 = arith.constant 2.000000e+00 : f32
    %91 = vector.broadcast %cst_41 : f32 to vector<4x256xf32>
    %92 = arith.mulf %90, %91 : vector<4x256xf32>
    %93 = arith.addf %3, %77 : vector<4x256xf32>
    %cst_42 = arith.constant 2.000000e+00 : f32
    %94 = vector.broadcast %cst_42 : f32 to vector<4x256xf32>
    %95 = arith.mulf %93, %94 : vector<4x256xf32>
    %96 = arith.addf %5, %89 : vector<4x256xf32>
    %cst_43 = arith.constant 2.000000e+00 : f32
    %97 = vector.broadcast %cst_43 : f32 to vector<4x256xf32>
    %98 = arith.mulf %96, %97 : vector<4x256xf32>
    %99 = arith.maximumf %92, %95 : vector<4x256xf32>
    %100 = arith.maximumf %99, %98 : vector<4x256xf32>
    %101 = arith.subf %92, %100 : vector<4x256xf32>
    %102 = math.exp %101 : vector<4x256xf32>
    %103 = arith.subf %95, %100 : vector<4x256xf32>
    %104 = math.exp %103 : vector<4x256xf32>
    %105 = arith.subf %98, %100 : vector<4x256xf32>
    %106 = math.exp %105 : vector<4x256xf32>
    %107 = arith.addf %102, %104 : vector<4x256xf32>
    %108 = arith.addf %107, %106 : vector<4x256xf32>
    %109 = tpu.reciprocal %108 {approx = true} : vector<4x256xf32> -> vector<4x256xf32>
    %110 = arith.mulf %108, %109 : vector<4x256xf32>
    %cst_44 = arith.constant 2.000000e+00 : f32
    %111 = vector.broadcast %cst_44 : f32 to vector<4x256xf32>
    %112 = arith.subf %111, %110 : vector<4x256xf32>
    %113 = arith.mulf %109, %112 : vector<4x256xf32>
    %114 = arith.mulf %102, %113 : vector<4x256xf32>
    %c0_45 = arith.constant 0 : index
    %c0_46 = arith.constant 0 : index
    %c0_47 = arith.constant 0 : index
    %115 = vector.load %arg5[%c0_45, %c0_46, %c0_47] : memref<3x4x256xf32, #tpu.memory_space<vmem>>, vector<1x4x256xf32>
    %116 = vector.shape_cast %115 : vector<1x4x256xf32> to vector<4x256xf32>
    %117 = vector.shape_cast %114 : vector<4x256xf32> to vector<1x4x256xf32>
    tpu.vector_store %arg5[%c0_45, %c0_46, %c0_47], %117 {strides = array<i32>} : memref<3x4x256xf32, #tpu.memory_space<vmem>>, vector<1x4x256xf32>,
    %118 = arith.mulf %104, %113 : vector<4x256xf32>
    %c1_48 = arith.constant 1 : index
    %c0_49 = arith.constant 0 : index
    %c0_50 = arith.constant 0 : index
    %119 = vector.load %arg5[%c1_48, %c0_49, %c0_50] : memref<3x4x256xf32, #tpu.memory_space<vmem>>, vector<1x4x256xf32>
    %120 = vector.shape_cast %119 : vector<1x4x256xf32> to vector<4x256xf32>
    %121 = vector.shape_cast %118 : vector<4x256xf32> to vector<1x4x256xf32>
    tpu.vector_store %arg5[%c1_48, %c0_49, %c0_50], %121 {strides = array<i32>} : memref<3x4x256xf32, #tpu.memory_space<vmem>>, vector<1x4x256xf32>,
    %122 = arith.mulf %106, %113 : vector<4x256xf32>
    %c2_51 = arith.constant 2 : index
    %c0_52 = arith.constant 0 : index
    %c0_53 = arith.constant 0 : index
    %123 = vector.load %arg5[%c2_51, %c0_52, %c0_53] : memref<3x4x256xf32, #tpu.memory_space<vmem>>, vector<1x4x256xf32>
    %124 = vector.shape_cast %123 : vector<1x4x256xf32> to vector<4x256xf32>
    %125 = vector.shape_cast %122 : vector<4x256xf32> to vector<1x4x256xf32>
    tpu.vector_store %arg5[%c2_51, %c0_52, %c0_53], %125 {strides = array<i32>} : memref<3x4x256xf32, #tpu.memory_space<vmem>>, vector<1x4x256xf32>,
    return
  }
  func.func @transform_0(%arg0: i32) -> (i32, i32, i32) {
    %c0_i32 = arith.constant 0 : i32
    %c0_i32_0 = arith.constant 0 : i32
    %c0_i32_1 = arith.constant 0 : i32
    return %c0_i32, %c0_i32_0, %arg0 : i32, i32, i32
  }
  func.func @transform_1(%arg0: i32) -> (i32, i32, i32) {
    %c0_i32 = arith.constant 0 : i32
    %c0_i32_0 = arith.constant 0 : i32
    %c0_i32_1 = arith.constant 0 : i32
    return %c0_i32, %c0_i32_0, %arg0 : i32, i32, i32
  }
  func.func @transform_2(%arg0: i32) -> (i32, i32, i32) {
    %c0_i32 = arith.constant 0 : i32
    %c0_i32_0 = arith.constant 0 : i32
    %c0_i32_1 = arith.constant 0 : i32
    return %c0_i32, %c0_i32_0, %arg0 : i32, i32, i32
  }
  func.func @transform_3(%arg0: i32) -> (i32, i32, i32) {
    %c0_i32 = arith.constant 0 : i32
    %c0_i32_0 = arith.constant 0 : i32
    %c0_i32_1 = arith.constant 0 : i32
    return %arg0, %c0_i32, %c0_i32_0 : i32, i32, i32
  }
  func.func @transform_4(%arg0: i32) -> (i32, i32, i32) {
    %c0_i32 = arith.constant 0 : i32
    %c0_i32_0 = arith.constant 0 : i32
    %c0_i32_1 = arith.constant 0 : i32
    return %c0_i32, %c0_i32_0, %arg0 : i32, i32, i32
  }
}

</mosaic_0001>

<bundles_post_ra>
// kernel: tpu_custom_call.1
= control target key start
LH: loop header
LB: loop body
LE: loop exit
PB: predicated region body
PF: predicated region fallthrough
CT: control target
= control target key end

     0   :  { %s1218_s0 = inlined_call_operand.hbm [shape: f32[3,4,1024], index: 0, kind: input, shape index: {}]   ;;  %s1219_s1 = inlined_call_operand.hbm [shape: f32[3,1,1024], index: 1, kind: input, shape index: {}]   ;;  %s1220_s2 = inlined_call_operand.hbm [shape: f32[3,4,1024], index: 2, kind: input, shape index: {}]   ;;  %s1221_s3 = inlined_call_operand.hbm [shape: f32[4,8,128], index: 3, kind: output, shape index: {0}]   ;;  %s1222_s4 = inlined_call_operand.hbm [shape: f32[3,4,1024], index: 4, kind: output, shape index: {1}]  }
   0x1   :  { %1230 = sst [smem:[#allocation19_spill]] %s1219_s1 }
   0x2   :  { %10 = vsyncpa [#allocation3], 0 }
   0x3   :  { %12 = vsyncpa [#allocation3 + $0x1], 0 }
   0x4   :  { %13 = vsyncpa [#allocation6], 0 }
   0x5   :  { %15 = vsyncpa [#allocation6 + $0x1], 0 }
   0x6   :  { %16 = vsyncpa [#allocation4], 0 }
   0x7   :  { %18 = vsyncpa [#allocation4 + $0x1], 0 }
   0x8   :  { %19 = vsyncpa [#allocation10], 0 }
   0x9   :  { %21 = vsyncpa [#allocation10 + $0x1], 0  ;;  %s998_s15 = smov 0   ;;  %s1000_s16 = smov 0  }
   0xa   :  { %s1002_s17 = smov 0   ;;  %s1004_s18 = smov 0  }
   0xb LB: > { %1231 = sst [smem:[#allocation15_spill]] %s959_s17  ;;  %s1019_s19 = sadd.s32 4294967295, %s963_s18   ;;  %s963_s18 = sphi %s1004_s18, %s1244_s18   ;;  %s959_s17 = sphi %s1002_s17, %s1246_s17   ;;  %s955_s16 = sphi %s1000_s16, %s1248_s16   ;;  %s951_s15 = sphi %s998_s15, %s1247_s15  }
   0xc   : > { %s638_s20 = sadd.s32 4294967294, %s963_s18   ;;  %s1023_s21 = sadd.s32 1, %s963_s18  }
   0xd   : > { %1232 = sst [smem:[#allocation16_spill]] %s1023_s21  ;;  %s34_s22 = sadd.s32 1, %s959_s17 }
   0xe   : > { %s31_s23 = ssub.s32 %s963_s18, %s1023_s21  ;;  %p41_p0 = scmp.ne.s32.totalorder %s959_s17, %s955_s16 }
   0xf   : > { %p32_p1 = scmp.eq.s32.totalorder %s31_s23, 0  ;;  %p42_p2 = scmp.eq.s32.totalorder %s963_s18, 0 }
  0x10   : > { %p47_p3 = scmp.ne.s32.totalorder %s955_s16, %s951_s15  ;;  %p48_p4 = scmp.eq.s32.totalorder %s1019_s19, 0 }
  0x11   : > { %s1035_s24 = scalar_select %p32_p1, %s959_s17, %s34_s22  }
  0x12   : > { %p43_p5 = por %p42_p2, %p41_p0  ;;  %p1037_p6 = por %p48_p4, %p47_p3 }
  0x13   : > { %1233 = sst [smem:[#allocation17_spill]] %s1035_s24  ;;  %p123_p7 = scmp.eq.s32.totalorder %s1019_s19, 3 }
  0x14   : > { %p129_p8 = scmp.eq.s32.totalorder %s638_s20, 3  ;;  %p699_p9 = scmp.lt.s32.totalorder %s963_s18, 4 }
  0x15   : > { %p1043_p10 = por %p123_p7, %p41_p0  ;;  %s1052_s28 = sand.u32 1, %s959_s17  }
  0x16   : > { %p1047_p11 = por %p129_p8, %p47_p3  ;;  %p1054_p12 = pnand %p699_p9, %p43_p5 }
  0x17   : > { %s197_s30 = sand.u32 1, %s963_s18   ;;  %s666_s5 = smul.u32 6, %s1052_s28 }
  0x18   : > { %s1236_s27 = scalar_select %p1047_p11, 1, 0 }
  0x19   : > { %s643_s6 = sshll.u32 %s963_s18, 1  ;;  %s1239_s1 = sld [smem:[#allocation19_spill]] }
  0x1a   : > { %1237 = sst [smem:[#allocation18_spill]] %s1236_s27  ;;  %s201_s11 = scalar_lea.vmem [#allocation5], %s666_s5 }
  0x1b   : > { %s208_s12 = sshll.u32 %s201_s11, 4  ;;  %s1064_s13 = scalar_lea.sflag [#allocation6], %s197_s30  ;;  %s209_s12 = int_to_ptr.vmem [resolvable:$true] %s208_s12 }
  0x1c   : > { %p775_p0 = pneg %p1054_p12 }
  0x1f   : > { %s205_s9 = scalar_lea.hbm %s1239_s1, %s643_s6  ;;  %s778_s6 = scalar_lea.hbm %s1239_s1, 24 }
  0x20   : > { %s206_s10 = sshll.u32 %s205_s9, 4  ;;  %s207_s10 = int_to_ptr.hbm [resolvable:$true] %s206_s10 }
  0x21   : > { %s771_s14 = sshra.s32 %s207_s10, 4  ;;  %s772_s14 = int_to_ptr.hbm [resolvable:$true] %s771_s14 }
  0x22   : > { %s773_s20 = scalar_lea.hbm %s772_s14, 6  ;;  %p779_p3 = scmp.lt.s32.totalorder %s772_s14, %s1239_s1 }
  0x23   : > { %p774_p13 = scmp.ne.s32.totalorder %s772_s14, %s773_s20  ;;  %p780_p4 = scmp.lt.s32.totalorder %s778_s6, %s773_s20 }
  0x25   : > { %p776_p1 = pnand %p775_p0, %p774_p13  ;;  %p781_p5 = por %p780_p4, %p779_p3 }
  0x27   : > { %p777_p2 = pneg %p776_p1 }
  0x29   : > { %p782_p7 = pnand %p781_p5, %p777_p2 }
  0x2b   : > { %785 = shalt.err (!%p782_p7)
}
  0x2c   : > { %s1223_s30 = smov 128   ;;  %s966_s8 = smov 32  }
  0x2d   : > { %s967_s9 = smov 2   ;;  %p646_p8 = scmp.ge.s32.totalorder %s963_s18, 1 }
  0x2e   : > { %688 = dma.hbm_to_vmem [thread:$0]  (!%p1054_p12), %s207_s10, 96, %s209_s12, %s1064_s13, %s1223_s30, %s966_s8, %s967_s9  }
  0x2f   : > { %p238_p9 = scmp.lt.s32.totalorder %s963_s18, 5  ;;  %s1225_s11 = smul.u32 24, %s1052_s28 }
  0x30   : > { %s662_s20 = sshll.u32 %s963_s18, 3  ;;  %s176_s10 = scalar_lea.sflag [#allocation3], %s1052_s28 }
  0x31   : > { %p1084_p13 = pnand %p646_p8, %p238_p9  ;;  %s184_s6 = scalar_lea.hbm %s1218_s0, %s662_s20 }
  0x32   : > { %s185_s7 = sshll.u32 %s184_s6, 4  ;;  %s179_s5 = scalar_lea.vmem [#allocation2], %s1225_s11  ;;  %s186_s7 = int_to_ptr.hbm [resolvable:$true] %s185_s7 }
  0x33   : > { %s187_s1 = sshll.u32 %s179_s5, 4  ;;  %s801_s12 = sshra.s32 %s186_s7, 4  ;;  %s188_s1 = int_to_ptr.vmem [resolvable:$true] %s187_s1  ;;  %s802_s12 = int_to_ptr.hbm [resolvable:$true] %s801_s12 }
  0x34   : > { %s803_s8 = scalar_lea.hbm %s802_s12, 24  ;;  %s808_s22 = scalar_lea.hbm %s1218_s0, 96 }
  0x35   : > { %p804_p1 = scmp.ne.s32.totalorder %s802_s12, %s803_s8  ;;  %p809_p4 = scmp.lt.s32.totalorder %s802_s12, %s1218_s0 }
  0x36   : > { %p810_p5 = scmp.lt.s32.totalorder %s808_s22, %s803_s8 }
  0x37   : > { %p806_p2 = pnand %p804_p1, %p775_p0 }
  0x38   : > { %p811_p7 = por %p810_p5, %p809_p4 }
  0x39   : > { %p807_p3 = pneg %p806_p2 }
  0x3b   : > { %p812_p8 = pnand %p811_p7, %p807_p3 }
  0x3d   : > { %815 = shalt.err (!%p812_p8)
}
  0x3e   : > { %s968_s5 = smov 512   ;;  %s969_s11 = smov 8  }
  0x3f   : > { %s1241_s24 = smov 128   ;;  %s227_s30 = scalar_lea.hbm %s1220_s2, %s662_s20 }
  0x40   : > { %685 = dma.hbm_to_vmem [thread:$0]  (!%p1054_p12), %s186_s7, 384, %s188_s1, %s176_s10, %s968_s5, %s1241_s24, %s969_s11  }
  0x41   : > { %s228_s9 = sshll.u32 %s227_s30, 4  ;;  %s1242_s27 = smul.u32 24, %s1052_s28  ;;  %s229_s9 = int_to_ptr.hbm [resolvable:$true] %s228_s9 }
  0x42   : > { %s831_s8 = sshra.s32 %s229_s9, 4  ;;  %s838_s7 = scalar_lea.hbm %s1220_s2, 96  ;;  %s832_s8 = int_to_ptr.hbm [resolvable:$true] %s831_s8 }
  0x43   : > { %s222_s23 = scalar_lea.vmem [#allocation7], %s1242_s27  ;;  %s833_s22 = scalar_lea.hbm %s832_s8, 24 }
  0x44   : > { %s230_s12 = sshll.u32 %s222_s23, 4  ;;  %p834_p9 = scmp.ne.s32.totalorder %s832_s8, %s833_s22  ;;  %s231_s12 = int_to_ptr.vmem [resolvable:$true] %s230_s12 }
  0x45   : > { %p839_p3 = scmp.lt.s32.totalorder %s832_s8, %s1220_s2  ;;  %p840_p4 = scmp.lt.s32.totalorder %s838_s7, %s833_s22 }
  0x46   : > { %p836_p1 = pnand %p834_p9, %p775_p0 }
  0x47   : > { %p841_p5 = por %p840_p4, %p839_p3 }
  0x48   : > { %p837_p2 = pneg %p836_p1 }
  0x4a   : > { %p842_p7 = pnand %p841_p5, %p837_p2 }
  0x4c   : > { %845 = shalt.err (!%p842_p7)
}
  0x4d   : > { %691 = dma.hbm_to_vmem [thread:$0]  (!%p1054_p12), %s229_s9, 384, %s231_s12, %s1064_s13, %s968_s5, %s1241_s24, %s969_s11  }
  0x4e   : > { %242 = sbr.rel (%p1084_p13) target bundleno = 325 (0x145), region = 32  ;;  %s1128_s27 = sand.u32 (!%p1084_p13), 1, %s955_s16  }
  0x4f   : > { %s1131_s28 = smul.u32 (!%p1084_p13), 24, %s1128_s27  ;;  %s245_s20 = scalar_lea.sflag (!%p1084_p13), [#allocation3], %s1128_s27 }
  0x51   : > { %s248_s10 = scalar_lea.vmem (!%p1084_p13), [#allocation2], %s1131_s28 }
  0x53   : > { %934 = dma.done.wait (%p1037_p6), %s245_s20, 384  }
  0x54   : > { %936 = vsyncadd (%p1037_p6), %s245_s20, 4294966912  ;;  %s254_s24 = sand.u32 1, %s1019_s19   ;;  %s669_s29 = smul.u32 6, %s1128_s27 }
  0x55   : > { %s255_s13 = scalar_lea.sflag [#allocation6], %s254_s24 }
  0x56   : > { %s258_s11 = scalar_lea.vmem [#allocation5], %s669_s29 }
  0x57   : > { %938 = dma.done.wait (%p1037_p6), %s255_s13, 480  }
  0x58   : > { %940 = vsyncadd (%p1037_p6), %s255_s13, 4294966816  ;;  %v1145_v0 = vld [vmem:[%s248_s10] sm:$0xff]  ;;  %v1147_v1 = vld [vmem:[%s248_s10 + $0x8] sm:$0xff]  ;;  %vm347_vm0 = vcmask 1043456   ;;  %s268_s25 = scalar_lea.vmem [#allocation7], %s1131_s28  ;;  %s657_s14 = sshll.u32 %s1019_s19, 3 }
  0x59   : > { %v1149_v2 = vld [vmem:[%s248_s10 + $0x10] sm:$0xff]  ;;  %v318_v3 = vmax.f32 %v1145_v0, %v1147_v1  ;;  %v394_v23 = vld [vmem:[%s268_s25] sm:$0xff]  ;;  %v652_v24 = vld [vmem:[%s268_s25 + $0x8] sm:$0xff]  ;;  %s485_s9 = scalar_lea.hbm %s1222_s4, %s657_s14  ;;  %s308_s12 = scalar_lea.vmem [#allocation9], %s1131_s28 }
  0x5a   : > { %v337_v15 = vld [vmem:[%s258_s11] sm:$0x3]  ;;  %v650_v16 = vld [vmem:[%s258_s11 + $0x2] sm:$0x3]  ;;  %v651_v17 = vld [vmem:[%s258_s11 + $0x4] sm:$0x3] }
  0x5b   : > { %v319_v4 = vmax.f32 %v318_v3, %v1149_v2  ;;  %v345_v19 = vperm.slane %v337_v15, 1  ;;  %v355_v20 = vperm.slane %v650_v16, 1  ;;  %v365_v21 = vperm.slane %v651_v17, 1  ;;  %v653_v25 = vld [vmem:[%s268_s25 + $0x10] sm:$0xff]  ;;  %s488_s23 = sshll.u32 %s485_s9, 4  ;;  %s486_s8 = sshll.u32 %s308_s12, 4  ;;  %s489_s23 = int_to_ptr.hbm [resolvable:$true] %s488_s23  ;;  %s487_s8 = int_to_ptr.vmem [resolvable:$true] %s486_s8 }
  0x5c   : > { %v344_v22 = vperm.slane %v337_v15, 0  ;;  %v354_v26 = vperm.slane %v650_v16, 0  ;;  %v395_v27 = vmax.f32 %v394_v23, 1.1920929e-07  ;;  %v405_v28 = vmax.f32 %v652_v24, 1.1920929e-07  ;;  %s460_s22 = scalar_lea.sflag [#allocation10], %s1128_s27  ;;  %s875_s6 = sshra.s32 %s489_s23, 4  ;;  %s876_s6 = int_to_ptr.hbm [resolvable:$true] %s875_s6 }
  0x5d   : > { %v320_v5 = vsub.f32 %v1145_v0, %v319_v4  ;;  %v323_v6 = vsub.f32 %v1147_v1, %v319_v4  ;;  %v326_v7 = vsub.f32 %v1149_v2, %v319_v4  ;;  %v415_v29 = vmax.f32 %v653_v25, 1.1920929e-07  ;;  %s877_s1 = scalar_lea.hbm %s876_s6, 24  ;;  %s881_s21 = scalar_lea.hbm %s1222_s4, 96 }
  0x5e   : > { %v346_v30 = vrot.slane %v345_v19, 4  ;;  %v356_v31 = vrot.slane %v355_v20, 4  ;;  %v364_v32 = vperm.slane %v651_v17, 0  ;;  %v366_v33 = vrot.slane %v365_v21, 4  ;;  %p878_p6 = scmp.ne.s32.totalorder %s876_s6, %s877_s1  ;;  %p882_p13 = scmp.lt.s32.totalorder %s876_s6, %s1222_s4 }
  0x5f   : > { %v321_v8 = vmul.f32 1.442695, %v320_v5  ;;  %v324_v9 = vmul.f32 1.442695, %v323_v6  ;;  %v327_v10 = vmul.f32 1.442695, %v326_v7  ;;  %p883_p8 = scmp.lt.s32.totalorder %s881_s21, %s877_s1 }
  0x60   : > { %v396_v34 = vmin.f32 %v395_v27, 0.9999999  ;;  %v406_v35 = vmin.f32 %v405_v28, 0.9999999  ;;  %v416_v36 = vmin.f32 %v415_v29, 0.9999999  ;;  %v348_v39 = vsel %vm347_vm0, %v344_v22, %v346_v30  ;;  %p879_p12 = pnand %p878_p6, %p1043_p10 }
  0x61   : > { %741 = vpow2.f32 %v321_v8  ;;  %v357_v40 = vsel %vm347_vm0, %v354_v26, %v356_v31  ;;  %v367_v41 = vsel %vm347_vm0, %v364_v32, %v366_v33  ;;  %v350_v44 = vsub.f32 %v320_v5, %v348_v39  ;;  %p884_p9 = por %p883_p8, %p882_p13 }
  0x62   : > { %743 = vpow2.f32 %v324_v9  ;;  %v359_v45 = vsub.f32 %v323_v6, %v357_v40  ;;  %v369_v46 = vsub.f32 %v326_v7, %v367_v41  ;;  %p880_p0 = pneg %p879_p12 }
  0x63   : > { %745 = vpow2.f32 %v327_v10 }
  0x64   : > { %p885_p1 = pnand %p884_p9, %p880_p0 }
  0x67   : > { %v742_v11 = vpop.eup %741 }
  0x68   : > { %v744_v12 = vpop.eup %743 }
  0x69   : > { %v746_v13 = vpop.eup %745  ;;  %v329_v14 = vadd.f32 %v744_v12, %v742_v11 }
  0x6b   : > { %v330_v18 = vadd.f32 %v746_v13, %v329_v14 }
  0x6d   : > { %747 = vrcp.f32 %v330_v18 }
  0x6e   : > { %749 = vlog2.f32 %v330_v18 }
  0x6f   : > { %751 = vlog2.f32 %v396_v34 }
  0x70   : > { %753 = vlog2.f32 %v406_v35 }
  0x71   : > { %755 = vlog2.f32 %v416_v36 }
  0x73   : > { %v748_v37 = vpop.eup %747 }
  0x74   : > { %v332_v38 = vmul.f32 %v748_v37, %v330_v18  ;;  %v750_v47 = vpop.eup %749 }
  0x75   : > { %v752_v48 = vpop.eup %751  ;;  %v336_v61 = vmul.f32 0.6931472, %v750_v47 }
  0x76   : > { %v333_v42 = vsub.f32 2.0, %v332_v38  ;;  %v754_v52 = vpop.eup %753  ;;  %v398_v53 = vmul.f32 0.6931472, %v752_v48 }
  0x77   : > { %v756_v54 = vpop.eup %755  ;;  %v408_v58 = vmul.f32 0.6931472, %v754_v52 }
  0x78   : > { %v334_v43 = vmul.f32 %v748_v37, %v333_v42  ;;  %v399_v59 = vsub.f32 0.0, %v398_v53  ;;  %v418_v60 = vmul.f32 0.6931472, %v756_v54 }
  0x79   : > { %v409_v63 = vsub.f32 0.0, %v408_v58 }
  0x7a   : > { %v342_v49 = vmul.f32 %v742_v11, %v334_v43  ;;  %v352_v50 = vmul.f32 %v744_v12, %v334_v43  ;;  %v362_v51 = vmul.f32 %v746_v13, %v334_v43  ;;  %757 = vlog2.f32 %v399_v59 }
  0x7b   : > { %v419_v3 = vsub.f32 0.0, %v418_v60  ;;  %759 = vlog2.f32 %v409_v63 }
  0x7c   : > { %v351_v55 = vmul.f32 %v350_v44, %v342_v49  ;;  %v360_v56 = vmul.f32 %v359_v45, %v352_v50  ;;  %v370_v57 = vmul.f32 %v369_v46, %v362_v51 }
  0x7d   : > { %761 = vlog2.f32 %v419_v3 }
  0x7e   : > { %v361_v62 = vadd.f32 %v360_v56, %v351_v55 }
  0x80   : > { %v371_v4 = vadd.f32 %v370_v57, %v361_v62  ;;  %v758_v6 = vpop.eup %757 }
  0x81   : > { %v760_v7 = vpop.eup %759  ;;  %v401_v8 = vmul.f32 0.6931472, %v758_v6 }
  0x82   : > { %v372_v5 = vsub.f32 %v371_v4, %v336_v61  ;;  %v411_v10 = vmul.f32 0.6931472, %v760_v7 }
  0x83   : > { %v762_v9 = vpop.eup %761  ;;  %v402_v11 = vsub.f32 0.0, %v401_v8 }
  0x84   : > { %374 = vst [vmem:[#allocation1] ss:$2 sm:$0xff] %v372_v5  ;;  %v421_v12 = vmul.f32 0.6931472, %v762_v9  ;;  %v412_v13 = vsub.f32 0.0, %v411_v10 }
  0x85   : > { %v423_v15 = vadd.f32 %v402_v11, %v1145_v0 }
  0x86   : > { %v422_v14 = vsub.f32 0.0, %v421_v12  ;;  %v425_v18 = vadd.f32 %v1147_v1, %v412_v13 }
  0x87   : > { %v424_v21 = vmul.f32 2.0, %v423_v15 }
  0x88   : > { %v427_v22 = vadd.f32 %v1149_v2, %v422_v14  ;;  %v426_v24 = vmul.f32 2.0, %v425_v18 }
  0x8a   : > { %v428_v25 = vmul.f32 2.0, %v427_v22  ;;  %v429_v26 = vmax.f32 %v424_v21, %v426_v24 }
  0x8b   : > { %v375_v16 = vld.sshfl [vmem:[#allocation1] sm:$0xff pattern:$0x75316420]  ;;  %v376_v17 = vld.sshfl [vmem:[#allocation1 + $0x8] sm:$0xff pattern:$0x75316420] }
  0x8c   : > { %v379_v19 = vsel %vm347_vm0, %v375_v16, 0.0  ;;  %v380_v20 = vsel %vm347_vm0, %v376_v17, 0.0  ;;  %v430_v27 = vmax.f32 %v429_v26, %v428_v25 }
  0x8d   : > { %v381_v23 = vadd.f32 %v380_v20, %v379_v19 }
  0x8e   : > { %v431_v28 = vsub.f32 %v424_v21, %v430_v27  ;;  %v434_v29 = vsub.f32 %v426_v24, %v430_v27  ;;  %v437_v0 = vsub.f32 %v428_v25, %v430_v27 }
  0x8f   : > { %382 = vadd.xlane.f32.xlu0 %v381_v23 }
  0x90   : > { %v432_v30 = vmul.f32 1.442695, %v431_v28  ;;  %v435_v31 = vmul.f32 1.442695, %v434_v29  ;;  %v438_v32 = vmul.f32 1.442695, %v437_v0 }
  0x92   : > { %763 = vpow2.f32 %v432_v30 }
  0x93   : > { %765 = vpow2.f32 %v435_v31 }
  0x94   : > { %767 = vpow2.f32 %v438_v32 }
  0x98   : > { %v764_v1 = vpop.eup %763 }
  0x99   : > { %v766_v33 = vpop.eup %765 }
  0x9a   : > { %v768_v34 = vpop.eup %767  ;;  %v440_v2 = vadd.f32 %v766_v33, %v764_v1 }
  0x9c   : > { %v441_v35 = vadd.f32 %v768_v34, %v440_v2 }
  0x9e   : > { %769 = vrcp.f32 %v441_v35 }
  0xa4   : > { %v770_v43 = vpop.eup %769 }
  0xa5   : > { %v443_v44 = vmul.f32 %v770_v43, %v441_v35 }
  0xa7   : > { %v444_v45 = vsub.f32 2.0, %v443_v44 }
  0xa9   : > { %v445_v46 = vmul.f32 %v770_v43, %v444_v45 }
  0xab   : > { %v446_v47 = vmul.f32 %v764_v1, %v445_v46  ;;  %v448_v48 = vmul.f32 %v766_v33, %v445_v46  ;;  %v451_v49 = vmul.f32 %v768_v34, %v445_v46 }
  0xad   : > { %447 = vst [vmem:[%s308_s12] sm:$0xff] %v446_v47 }
  0xae   : > { %654 = vst [vmem:[%s308_s12 + $0x8] sm:$0xff] %v448_v48 }
  0xaf   : > { %655 = vst [vmem:[%s308_s12 + $0x10] sm:$0xff] %v451_v49 }
 0x102   : > { %v383_v36 = vpop.xlane.xlu0 %382 }
 0x103   : > { %v384_v37 = vrot.slane %v383_v36, 4 }
 0x105   : > { %v385_v38 = vadd.f32 %v384_v37, %v383_v36 }
 0x107   : > { %v386_v39 = vrot.slane %v385_v38, 2 }
 0x109   : > { %v387_v40 = vadd.f32 %v386_v39, %v385_v38 }
 0x10b   : > { %v388_v41 = vrot.slane %v387_v40, 1 }
 0x10d   : > { %v389_v42 = vadd.f32 %v388_v41, %v387_v40 }
 0x10f   : > { %670 = vpush %v389_v42 }
 0x110   : > { %888 = shalt.err (!%p885_p1)
}
 0x111   : > { %s970_s10 = smov 128   ;;  %s971_s24 = smov 512  }
 0x112   : > { %s972_s29 = smov 8   ;;  %s647_s13 = sshll.u32 %s1128_s27, 3 }
 0x113   : > { %679 = dma.vmem_to_hbm [thread:$0]  (%p1043_p10), %s487_s8, 384, %s489_s23, %s460_s22, %s970_s10, %s971_s24, %s972_s29  }
 0x114   : > { %s470_s5 = scalar_lea.hbm %s1221_s3, %s657_s14  ;;  %s301_s30 = scalar_lea.vmem [#allocation8], %s647_s13 }
 0x115   : > { %s472_s9 = sshll.u32 %s301_s30, 4  ;;  %s474_s12 = sshll.u32 %s470_s5, 4  ;;  %s473_s9 = int_to_ptr.vmem [resolvable:$true] %s472_s9  ;;  %s475_s12 = int_to_ptr.hbm [resolvable:$true] %s474_s12 }
 0x116   : > { %s455_s1 = scalar_lea.sflag [#allocation4], %s1128_s27  ;;  %s903_s7 = sshra.s32 %s475_s12, 4  ;;  %s904_s7 = int_to_ptr.hbm [resolvable:$true] %s903_s7 }
 0x117   : > { %s905_s17 = scalar_lea.hbm %s904_s7, 8  ;;  %s909_s14 = scalar_lea.hbm %s1221_s3, 32 }
 0x118   : > { %p906_p2 = scmp.ne.s32.totalorder %s904_s7, %s905_s17  ;;  %p910_p5 = scmp.lt.s32.totalorder %s904_s7, %s1221_s3 }
 0x119   : > { %p911_p7 = scmp.lt.s32.totalorder %s909_s14, %s905_s17 }
 0x11a   : > { %p907_p3 = pnand %p906_p2, %p1043_p10 }
 0x11b   : > { %p912_p6 = por %p911_p7, %p910_p5 }
 0x11c   : > { %p908_p4 = pneg %p907_p3 }
 0x11e   : > { %p913_p12 = pnand %p912_p6, %p908_p4 }
 0x140   : > { %s671_s6 = spop %670 }
 0x141   : > { %v391_v50 = vstv %s671_s6 }
 0x142   : > { %393 = vst [vmem:[%s301_s30] sm:$0xff] %v391_v50 }
 0x143   : > { %916 = shalt.err (!%p913_p12)
}
 0x144   : > { %678 = dma.vmem_to_hbm [thread:$0]  (%p1043_p10), %s473_s9, 128, %s475_s12, %s455_s1  }
 0x145 PF: > { %p700_p0 = scmp.ge.s32.totalorder %s963_s18, 2  ;;  %s503_s21 = sand.u32 1, %s951_s15  }
 0x146   : > { %s504_s28 = scalar_lea.sflag [#allocation4], %s503_s21 }
 0x147   : > { %p693_p13 = pnand %p700_p0, %p1047_p11 }
 0x149   : > { %p694_p8 = pneg %p693_p13 }
 0x14b   : > { %942 = dma.done.wait (%p694_p8), %s504_s28, 128  }
 0x14c   : > { %944 = vsyncadd (%p694_p8), %s504_s28, 4294967168  ;;  %s514_s20 = scalar_lea.sflag [#allocation10], %s503_s21 }
 0x14d   : > { %946 = dma.done.wait (%p694_p8), %s514_s20, 384  }
 0x14e   : > { %948 = vsyncadd (%p694_p8), %s514_s20, 4294966912  ;;  %s1244_s18 = sld [smem:[#allocation16_spill]]  ;;  %s1247_s15 = smov %s955_s16 }
 0x14f   : > { %s1245_s10 = sld [smem:[#allocation15_spill]] }
 0x150   : > { %s1246_s17 = sld [smem:[#allocation17_spill]] }
 0x154   : > { %p24_p10 = scmp.ge.s32.totalorder %s1244_s18, 6  }
 0x155   : > { %s1248_s16 = smov %s1245_s10 }
 0x156   :  { %26 = sbr.rel (!%p24_p10) target bundleno = 11 (0xb), region = 126 }
 0x15b   :  { %520 = vsyncpa [#allocation3], 1 }
 0x15c   :  { %522 = vsyncpa [#allocation3 + $0x1], 1 }
 0x15d   :  { %523 = vsyncpa [#allocation6], 1 }
 0x15e   :  { %525 = vsyncpa [#allocation6 + $0x1], 1 }
 0x15f   :  { %526 = vsyncpa [#allocation4], 1 }
 0x160   :  { %528 = vsyncpa [#allocation4 + $0x1], 1 }
 0x161   :  { %529 = vsyncpa [#allocation10], 1 }
 0x162   :  { %531 = vsyncpa [#allocation10 + $0x1], 1 }

</bundles_post_ra>
